<compile_context>
chip_gen: v7x
topology: tpu7x:2x2x1
jax: 0.10.0
libtpu: 0.0.40
codegen_flags: <defaults>
</compile_context>

<pallas_src>
import jax
import jax.numpy as jnp
from jax.experimental import pallas as pl
from jax.experimental.pallas import tpu as pltpu

LANE = 128  # padded (lane-dense) feature width


# ---------------------------------------------------------------------------
# Fused Pallas kernel: whole stage in one pallas_call
# ---------------------------------------------------------------------------
def make_fused_stage_kernel(num_layers, layer_dims):
    """layer_dims: static tuple of (c_in_logical, c_out_logical) per layer."""

    def kernel(adj_ref, x_ref, w_ref, b_ref, out_ref):
        # Load once, reuse across all layers (no intermediate HBM traffic).
        adj = adj_ref[...].astype(jnp.bfloat16)      # [N, N]   MXU input
        h = x_ref[...].astype(jnp.float32)           # [N, 128] running features

        for l in range(num_layers):                  # static unrolled loop
            c_in, c_out = layer_dims[l]
            w = w_ref[l].astype(jnp.bfloat16)        # [128, 128]
            b = b_ref[l]                             # [1, 128]  f32

            # (A @ h) @ W  -- bf16 MXU inputs, f32 accumulation.
            ah = jnp.dot(adj, h.astype(jnp.bfloat16),
                         preferred_element_type=jnp.float32)
            hw = jnp.dot(ah.astype(jnp.bfloat16), w,
                         preferred_element_type=jnp.float32)

            # bias + ReLU in f32 (VPU)
            act = jnp.maximum(hw + b, 0.0)

            # F.normalize(act, p=2, dim=1) via EUP rsqrt (eps = 1e-12 on the norm)
            ssq = jnp.sum(act * act, axis=-1, keepdims=True)
            inv = jax.lax.rsqrt(jnp.maximum(ssq, 1e-24))
            new_h = act * inv

            # 'my_skipsum' residual, fused in-kernel (only when logical dims match)
            if c_in == c_out:
                new_h = h + new_h
            h = new_h

        # Stage-final L2 normalize folded into the same kernel.
        ssq = jnp.sum(h * h, axis=-1, keepdims=True)
        inv = jax.lax.rsqrt(jnp.maximum(ssq, 1e-24))
        out_ref[...] = (h * inv).astype(out_ref.dtype)

    return kernel


def _full_spec(shape):
    return pl.BlockSpec(shape, lambda: (0,) * len(shape))


# ---------------------------------------------------------------------------
# Wrapper: pad to lane-dense layout, single fused pallas_call, slice back
# ---------------------------------------------------------------------------
def gnn_stack_stage_forward(x, adj, params):
    """params: list of (W [c_in, c_out], b [1, c_out]) per GeneralLayer2."""
    n, c_in0 = x.shape
    num_layers = len(params)

    layer_dims = []
    d = c_in0
    for w, _ in params:
        layer_dims.append((d, w.shape[1]))
        d = w.shape[1]
    c_out_final = layer_dims[-1][1]

    cpad = LANE
    assert max(max(ci, co) for ci, co in layer_dims) <= cpad

    # Zero-pad to lane-dense layout (harmless for matmul / bias / L2 norm).
    x_p = jnp.pad(x.astype(jnp.float32), ((0, 0), (0, cpad - c_in0)))
    w_p = jnp.stack([
        jnp.pad(w.astype(jnp.float32),
                ((0, cpad - w.shape[0]), (0, cpad - w.shape[1])))
        for w, _ in params
    ])                                               # [L, 128, 128]
    b_p = jnp.stack([
        jnp.pad(b.astype(jnp.float32), ((0, 0), (0, cpad - b.shape[1])))
        for _, b in params
    ])                                               # [L, 1, 128]

    kernel = make_fused_stage_kernel(num_layers, tuple(layer_dims))

    out_p = pl.pallas_call(
        kernel,
        out_shape=jax.ShapeDtypeStruct((n, cpad), jnp.float32),
        grid=(),
        in_specs=[
            _full_spec(adj.shape),
            _full_spec(x_p.shape),
            _full_spec(w_p.shape),
            _full_spec(b_p.shape),
        ],
        out_specs=_full_spec((n, cpad)),
    )(adj, x_p, w_p, b_p)

    # Slice padded output back to the logical feature width.
    return out_p[:, :c_out_final]


# ---------------------------------------------------------------------------
# Pure-JAX reference (f32) for correctness check
# ---------------------------------------------------------------------------
def reference_forward(x, adj, params):
    h = x.astype(jnp.float32)
    for w, b in params:
        h_in = h
        z = jnp.maximum(adj @ (h @ w) + b, 0.0)
        nrm = jnp.sqrt(jnp.sum(z * z, axis=-1, keepdims=True))
        z = z / jnp.maximum(nrm, 1e-12)
        if z.shape[-1] == h_in.shape[-1]:
            z = h_in + z
        h = z
    nrm = jnp.sqrt(jnp.sum(h * h, axis=-1, keepdims=True))
    return h / jnp.maximum(nrm, 1e-12)


# ---------------------------------------------------------------------------
# Deterministic parameter / graph construction (glue, plain JAX)
# ---------------------------------------------------------------------------
def build_normalized_adjacency(num_nodes):
    """Ring graph + self loops, symmetric-normalized: D^-1/2 (A+I) D^-1/2."""
    idx = jnp.arange(num_nodes)
    a = jnp.zeros((num_nodes, num_nodes), jnp.float32)
    a = a.at[idx, (idx + 1) % num_nodes].set(1.0)
    a = a.at[(idx + 1) % num_nodes, idx].set(1.0)
    a = a + jnp.eye(num_nodes, dtype=jnp.float32)
    deg = jnp.sum(a, axis=-1)
    d_inv_sqrt = 1.0 / jnp.sqrt(deg)
    return a * d_inv_sqrt[:, None] * d_inv_sqrt[None, :]


def init_params(key, dim_in, dim_out, num_layers):
    params = []
    d_in = dim_in
    for _ in range(num_layers):
        key, kw, kb = jax.random.split(key, 3)
        scale = 1.0 / jnp.sqrt(jnp.float32(d_in))
        w = jax.random.normal(kw, (d_in, dim_out), jnp.float32) * scale
        b = jax.random.normal(kb, (1, dim_out), jnp.float32) * 0.01
        params.append((w, b))
        d_in = dim_out
    return params


if __name__ == "__main__":
    num_nodes = 32
    dim_in = 16
    dim_out = 32
    num_layers = 3

    key = jax.random.PRNGKey(0)
    key, kx = jax.random.split(key)
    x = jax.random.normal(kx, (num_nodes, dim_in), jnp.float32)
    adj = build_normalized_adjacency(num_nodes)
    params = init_params(key, dim_in, dim_out, num_layers)

    out = gnn_stack_stage_forward(x, adj, params)
    out = jax.block_until_ready(out)

    assert out.shape == (num_nodes, dim_out)
    assert bool(jnp.all(jnp.isfinite(out)))

    # Rows must be unit-norm after the final L2 normalize.
    row_norms = jnp.sqrt(jnp.sum(out * out, axis=-1))
    assert jnp.allclose(row_norms, 1.0, atol=1e-4)

    # Compare against f32 reference (loose tol: bf16 MXU inputs, f32 accum).
    ref = reference_forward(x, adj, params)
    assert float(jnp.max(jnp.abs(out - ref))) < 0.1

    print("KERNEL_OK")
</pallas_src>

<mosaic_0001>
module attributes {stable_mosaic.version = 11 : i64} {
  func.func @kernel(%arg0: memref<32x32xf32, #tpu.memory_space<vmem>>, %arg1: memref<32x128xf32, #tpu.memory_space<vmem>>, %arg2: memref<3x128x128xf32, #tpu.memory_space<vmem>>, %arg3: memref<3x1x128xf32, #tpu.memory_space<vmem>>, %arg4: memref<32x128xf32, #tpu.memory_space<vmem>>) attributes {dimension_semantics = [], scalar_prefetch = 0 : i64, scratch_operands = 0 : i64, tpu.core_type = #tpu.core_type<tc>} {
    %c0 = arith.constant 0 : index
    %c0_0 = arith.constant 0 : index
    %0 = vector.load %arg0[%c0, %c0_0] : memref<32x32xf32, #tpu.memory_space<vmem>>, vector<32x32xf32>
    %1 = arith.truncf %0 : vector<32x32xf32> to vector<32x32xbf16>
    %c0_1 = arith.constant 0 : index
    %c0_2 = arith.constant 0 : index
    %2 = vector.load %arg1[%c0_1, %c0_2] : memref<32x128xf32, #tpu.memory_space<vmem>>, vector<32x128xf32>
    %c0_3 = arith.constant 0 : index
    %c0_4 = arith.constant 0 : index
    %c0_5 = arith.constant 0 : index
    %3 = vector.load %arg2[%c0_3, %c0_4, %c0_5] : memref<3x128x128xf32, #tpu.memory_space<vmem>>, vector<1x128x128xf32>
    %4 = vector.shape_cast %3 : vector<1x128x128xf32> to vector<128x128xf32>
    %5 = arith.truncf %4 : vector<128x128xf32> to vector<128x128xbf16>
    %c0_6 = arith.constant 0 : index
    %c0_7 = arith.constant 0 : index
    %c0_8 = arith.constant 0 : index
    %6 = vector.load %arg3[%c0_6, %c0_7, %c0_8] : memref<3x1x128xf32, #tpu.memory_space<vmem>>, vector<1x1x128xf32>
    %7 = vector.shape_cast %6 : vector<1x1x128xf32> to vector<1x128xf32>
    %8 = arith.truncf %2 : vector<32x128xf32> to vector<32x128xbf16>
    %cst = arith.constant dense<0.000000e+00> : vector<32x128xf32>
    %9 = tpu.matmul %1, %8, %cst {dimension_numbers = #tpu.dot_dimension_numbers<[1], [0], [0], [1], [0, 0, 1, 1], [], []>} : vector<32x32xbf16>, vector<32x128xbf16>, vector<32x128xf32> -> vector<32x128xf32>
    %10 = arith.truncf %9 : vector<32x128xf32> to vector<32x128xbf16>
    %cst_9 = arith.constant dense<0.000000e+00> : vector<32x128xf32>
    %11 = tpu.matmul %10, %5, %cst_9 {dimension_numbers = #tpu.dot_dimension_numbers<[1], [0], [0], [1], [0, 0, 1, 1], [], []>} : vector<32x128xbf16>, vector<128x128xbf16>, vector<32x128xf32> -> vector<32x128xf32>
    %12 = vector.broadcast %7 : vector<1x128xf32> to vector<32x128xf32>
    %13 = arith.addf %11, %12 : vector<32x128xf32>
    %cst_10 = arith.constant 0.000000e+00 : f32
    %14 = vector.broadcast %cst_10 : f32 to vector<32x128xf32>
    %15 = arith.maximumf %13, %14 : vector<32x128xf32>
    %16 = arith.mulf %15, %15 : vector<32x128xf32>
    %cst_11 = arith.constant dense<0.000000e+00> : vector<32xf32>
    %17 = vector.multi_reduction <add>, %16, %cst_11 [1] : vector<32x128xf32> to vector<32xf32>
    %18 = vector.shape_cast %17 : vector<32xf32> to vector<32x1xf32>
    %cst_12 = arith.constant 1.000000e-24 : f32
    %19 = vector.broadcast %cst_12 : f32 to vector<32x1xf32>
    %20 = arith.maximumf %18, %19 : vector<32x1xf32>
    %21 = math.rsqrt %20 : vector<32x1xf32>
    %22 = vector.broadcast %21 : vector<32x1xf32> to vector<32x128xf32>
    %23 = arith.mulf %15, %22 : vector<32x128xf32>
    %c1 = arith.constant 1 : index
    %c0_13 = arith.constant 0 : index
    %c0_14 = arith.constant 0 : index
    %24 = vector.load %arg2[%c1, %c0_13, %c0_14] : memref<3x128x128xf32, #tpu.memory_space<vmem>>, vector<1x128x128xf32>
    %25 = vector.shape_cast %24 : vector<1x128x128xf32> to vector<128x128xf32>
    %26 = arith.truncf %25 : vector<128x128xf32> to vector<128x128xbf16>
    %c1_15 = arith.constant 1 : index
    %c0_16 = arith.constant 0 : index
    %c0_17 = arith.constant 0 : index
    %27 = vector.load %arg3[%c1_15, %c0_16, %c0_17] : memref<3x1x128xf32, #tpu.memory_space<vmem>>, vector<1x1x128xf32>
    %28 = vector.shape_cast %27 : vector<1x1x128xf32> to vector<1x128xf32>
    %29 = arith.truncf %23 : vector<32x128xf32> to vector<32x128xbf16>
    %cst_18 = arith.constant dense<0.000000e+00> : vector<32x128xf32>
    %30 = tpu.matmul %1, %29, %cst_18 {dimension_numbers = #tpu.dot_dimension_numbers<[1], [0], [0], [1], [0, 0, 1, 1], [], []>} : vector<32x32xbf16>, vector<32x128xbf16>, vector<32x128xf32> -> vector<32x128xf32>
    %31 = arith.truncf %30 : vector<32x128xf32> to vector<32x128xbf16>
    %cst_19 = arith.constant dense<0.000000e+00> : vector<32x128xf32>
    %32 = tpu.matmul %31, %26, %cst_19 {dimension_numbers = #tpu.dot_dimension_numbers<[1], [0], [0], [1], [0, 0, 1, 1], [], []>} : vector<32x128xbf16>, vector<128x128xbf16>, vector<32x128xf32> -> vector<32x128xf32>
    %33 = vector.broadcast %28 : vector<1x128xf32> to vector<32x128xf32>
    %34 = arith.addf %32, %33 : vector<32x128xf32>
    %cst_20 = arith.constant 0.000000e+00 : f32
    %35 = vector.broadcast %cst_20 : f32 to vector<32x128xf32>
    %36 = arith.maximumf %34, %35 : vector<32x128xf32>
    %37 = arith.mulf %36, %36 : vector<32x128xf32>
    %cst_21 = arith.constant dense<0.000000e+00> : vector<32xf32>
    %38 = vector.multi_reduction <add>, %37, %cst_21 [1] : vector<32x128xf32> to vector<32xf32>
    %39 = vector.shape_cast %38 : vector<32xf32> to vector<32x1xf32>
    %cst_22 = arith.constant 1.000000e-24 : f32
    %40 = vector.broadcast %cst_22 : f32 to vector<32x1xf32>
    %41 = arith.maximumf %39, %40 : vector<32x1xf32>
    %42 = math.rsqrt %41 : vector<32x1xf32>
    %43 = vector.broadcast %42 : vector<32x1xf32> to vector<32x128xf32>
    %44 = arith.mulf %36, %43 : vector<32x128xf32>
    %45 = arith.addf %23, %44 : vector<32x128xf32>
    %c2 = arith.constant 2 : index
    %c0_23 = arith.constant 0 : index
    %c0_24 = arith.constant 0 : index
    %46 = vector.load %arg2[%c2, %c0_23, %c0_24] : memref<3x128x128xf32, #tpu.memory_space<vmem>>, vector<1x128x128xf32>
    %47 = vector.shape_cast %46 : vector<1x128x128xf32> to vector<128x128xf32>
    %48 = arith.truncf %47 : vector<128x128xf32> to vector<128x128xbf16>
    %c2_25 = arith.constant 2 : index
    %c0_26 = arith.constant 0 : index
    %c0_27 = arith.constant 0 : index
    %49 = vector.load %arg3[%c2_25, %c0_26, %c0_27] : memref<3x1x128xf32, #tpu.memory_space<vmem>>, vector<1x1x128xf32>
    %50 = vector.shape_cast %49 : vector<1x1x128xf32> to vector<1x128xf32>
    %51 = arith.truncf %45 : vector<32x128xf32> to vector<32x128xbf16>
    %cst_28 = arith.constant dense<0.000000e+00> : vector<32x128xf32>
    %52 = tpu.matmul %1, %51, %cst_28 {dimension_numbers = #tpu.dot_dimension_numbers<[1], [0], [0], [1], [0, 0, 1, 1], [], []>} : vector<32x32xbf16>, vector<32x128xbf16>, vector<32x128xf32> -> vector<32x128xf32>
    %53 = arith.truncf %52 : vector<32x128xf32> to vector<32x128xbf16>
    %cst_29 = arith.constant dense<0.000000e+00> : vector<32x128xf32>
    %54 = tpu.matmul %53, %48, %cst_29 {dimension_numbers = #tpu.dot_dimension_numbers<[1], [0], [0], [1], [0, 0, 1, 1], [], []>} : vector<32x128xbf16>, vector<128x128xbf16>, vector<32x128xf32> -> vector<32x128xf32>
    %55 = vector.broadcast %50 : vector<1x128xf32> to vector<32x128xf32>
    %56 = arith.addf %54, %55 : vector<32x128xf32>
    %cst_30 = arith.constant 0.000000e+00 : f32
    %57 = vector.broadcast %cst_30 : f32 to vector<32x128xf32>
    %58 = arith.maximumf %56, %57 : vector<32x128xf32>
    %59 = arith.mulf %58, %58 : vector<32x128xf32>
    %cst_31 = arith.constant dense<0.000000e+00> : vector<32xf32>
    %60 = vector.multi_reduction <add>, %59, %cst_31 [1] : vector<32x128xf32> to vector<32xf32>
    %61 = vector.shape_cast %60 : vector<32xf32> to vector<32x1xf32>
    %cst_32 = arith.constant 1.000000e-24 : f32
    %62 = vector.broadcast %cst_32 : f32 to vector<32x1xf32>
    %63 = arith.maximumf %61, %62 : vector<32x1xf32>
    %64 = math.rsqrt %63 : vector<32x1xf32>
    %65 = vector.broadcast %64 : vector<32x1xf32> to vector<32x128xf32>
    %66 = arith.mulf %58, %65 : vector<32x128xf32>
    %67 = arith.addf %45, %66 : vector<32x128xf32>
    %68 = arith.mulf %67, %67 : vector<32x128xf32>
    %cst_33 = arith.constant dense<0.000000e+00> : vector<32xf32>
    %69 = vector.multi_reduction <add>, %68, %cst_33 [1] : vector<32x128xf32> to vector<32xf32>
    %70 = vector.shape_cast %69 : vector<32xf32> to vector<32x1xf32>
    %cst_34 = arith.constant 1.000000e-24 : f32
    %71 = vector.broadcast %cst_34 : f32 to vector<32x1xf32>
    %72 = arith.maximumf %70, %71 : vector<32x1xf32>
    %73 = math.rsqrt %72 : vector<32x1xf32>
    %74 = vector.broadcast %73 : vector<32x1xf32> to vector<32x128xf32>
    %75 = arith.mulf %67, %74 : vector<32x128xf32>
    %c0_35 = arith.constant 0 : index
    %c0_36 = arith.constant 0 : index
    %76 = vector.load %arg4[%c0_35, %c0_36] : memref<32x128xf32, #tpu.memory_space<vmem>>, vector<32x128xf32>
    tpu.vector_store %arg4[%c0_35, %c0_36], %75 {strides = array<i32>} : memref<32x128xf32, #tpu.memory_space<vmem>>, vector<32x128xf32>,
    return
  }
}

</mosaic_0001>

<bundles_post_ra>
// kernel: tpu_custom_call.1
= control target key start
LH: loop header
LB: loop body
LE: loop exit
PB: predicated region body
PF: predicated region fallthrough
CT: control target
= control target key end

     0   :  { %9 = vsyncpa [#allocation3], 0  ;;  %s1052_s0 = inlined_call_operand.hbm [shape: f32[32,32], index: 0, kind: input, shape index: {}]   ;;  %s1053_s1 = inlined_call_operand.hbm [shape: f32[32,128], index: 1, kind: input, shape index: {}]   ;;  %s1054_s2 = inlined_call_operand.hbm [shape: f32[3,128,128], index: 2, kind: input, shape index: {}]   ;;  %s1055_s3 = inlined_call_operand.vmem [shape: f32[3,1,128], index: 3, kind: input, shape index: {}]   ;;  %s1056_s4 = inlined_call_operand.hbm [shape: f32[32,128], index: 4, kind: output, shape index: {}]  }
   0x1   :  { %10 = vsyncpa [#allocation6], 0 }
   0x2   :  { %11 = vsyncpa [#allocation4], 0  ;;  %s887_s15 = smov [#allocation5]   ;;  %s888_s17 = smov [#allocation2]  }
   0x3   :  { %s29_s16 = sshll.u32 %s887_s15, 4  ;;  %s17_s18 = sshll.u32 %s888_s17, 4  ;;  %s30_s16 = int_to_ptr.vmem [resolvable:$true] %s29_s16  ;;  %s918_s18 = int_to_ptr.vmem [resolvable:$true] %s17_s18 }
   0x4   :  { %s793_s21 = scalar_lea.hbm %s1053_s1, 512 }
   0x5   :  { %p794_p0 = scmp.ne.s32.totalorder %s1053_s1, %s793_s21  ;;  %p797_p1 = scmp.lt.u32.totalorder %s793_s21, %s1053_s1 }
   0x7   :  { %p799_p2 = pnand %p797_p1, %p794_p0 }
   0x9   :  { %802 = shalt.err (!%p799_p2)
}
   0xa   :  { %s803_s26 = scalar_lea.vmem %s30_s16, 512  ;;  %p808_p4 = scmp.lt.s32.totalorder %s30_s16, %s30_s16 }
   0xb   :  { %p804_p3 = scmp.ne.s32.totalorder %s30_s16, %s803_s26  ;;  %p809_p5 = scmp.lt.s32.totalorder %s803_s26, %s803_s26 }
   0xd   :  { %p810_p6 = por %p809_p5, %p808_p4 }
   0xf   :  { %p811_p7 = pnand %p810_p6, %p804_p3 }
  0x11   :  { %814 = shalt.err (!%p811_p7)
}
  0x12   :  { %s889_s27 = smov 128   ;;  %s890_s28 = smov 8  }
  0x13   :  { %35 = dma.hbm_to_vmem [thread:$0]  %s1053_s1, 512, %s30_s16, [#allocation6], %s889_s27, %s889_s27, %s890_s28  }
  0x14   :  { %s815_s7 = scalar_lea.hbm %s1052_s0, 512 }
  0x15   :  { %p816_p8 = scmp.ne.s32.totalorder %s1052_s0, %s815_s7  ;;  %p819_p9 = scmp.lt.u32.totalorder %s815_s7, %s1052_s0 }
  0x17   :  { %p821_p10 = pnand %p819_p9, %p816_p8 }
  0x19   :  { %824 = shalt.err (!%p821_p10)
}
  0x1a   :  { %s825_s12 = scalar_lea.vmem %s918_s18, 512  ;;  %p830_p12 = scmp.lt.s32.totalorder %s918_s18, %s918_s18 }
  0x1b   :  { %p826_p11 = scmp.ne.s32.totalorder %s918_s18, %s825_s12  ;;  %p831_p13 = scmp.lt.s32.totalorder %s825_s12, %s825_s12 }
  0x1d   :  { %p832_p0 = por %p831_p13, %p830_p12 }
  0x1f   :  { %p833_p1 = pnand %p832_p0, %p826_p11 }
  0x21   :  { %836 = shalt.err (!%p833_p1)
}
  0x22   :  { %23 = dma.hbm_to_vmem [thread:$0]  %s1052_s0, 512, %s918_s18, [#allocation3], %s889_s27, %s889_s27, %s890_s28  }
  0x23   :  { %s891_s14 = smov [#allocation7]   ;;  %s837_s19 = scalar_lea.hbm %s1054_s2, 6144 }
  0x24   :  { %s41_s15 = sshll.u32 %s891_s14, 4  ;;  %p838_p2 = scmp.ne.s32.totalorder %s1054_s2, %s837_s19  ;;  %s42_s15 = int_to_ptr.vmem [resolvable:$true] %s41_s15 }
  0x25   :  { %p841_p3 = scmp.lt.u32.totalorder %s837_s19, %s1054_s2 }
  0x27   :  { %p843_p4 = pnand %p841_p3, %p838_p2 }
  0x29   :  { %846 = shalt.err (!%p843_p4)
}
  0x2a   :  { %s847_s24 = scalar_lea.vmem %s42_s15, 6144  ;;  %p852_p6 = scmp.lt.s32.totalorder %s42_s15, %s42_s15 }
  0x2b   :  { %p848_p5 = scmp.ne.s32.totalorder %s42_s15, %s847_s24  ;;  %p853_p7 = scmp.lt.s32.totalorder %s847_s24, %s847_s24 }
  0x2d   :  { %p854_p8 = por %p853_p7, %p852_p6 }
  0x2f   :  { %p855_p9 = pnand %p854_p8, %p848_p5 }
  0x31   :  { %858 = shalt.err (!%p855_p9)
}
  0x32   :  { %47 = dma.hbm_to_vmem [thread:$0]  %s1054_s2, 6144, %s42_s15, [#allocation6], %s889_s27, %s889_s27, %s890_s28  }
  0x33   :  { %881 = dma.done.wait [#allocation3], 512  }
  0x34   :  { %882 = vsyncadd [#allocation3], 4294966784 }
  0x35   :  { %883 = dma.done.wait [#allocation6], 6656  }
  0x36   :  { %884 = vsyncadd [#allocation6], 4294960640  ;;  %v66_v0 = vld [vmem:[#allocation5] sm:$0xff]  ;;  %v67_v1 = vld [vmem:[#allocation5 + $0x8] sm:$0xff]  ;;  %vm97_vm0 = vcmask 261120  }
  0x37   :  { %v68_v2 = vld [vmem:[#allocation5 + $0x10] sm:$0xff]  ;;  %v95_v3 = vpack.c.bf16 %v67_v1, %v66_v0  ;;  %v69_v4 = vld [vmem:[#allocation5 + $0x18] sm:$0xff]  ;;  %v60_v5 = vld [vmem:[#allocation2] sm:$0xff] }
  0x38   :  { %v61_v6 = vld [vmem:[#allocation2 + $0x8] sm:$0xff]  ;;  %v96_v7 = vpack.c.bf16 %v69_v4, %v68_v2  ;;  %v70_v9 = vld [vmem:[#allocation7] sm:$0xff]  ;;  %v72_v11 = vld [vmem:[#allocation7 + $0x10] sm:$0xff] }
  0x39   :  { %v970_v8 = vpack.c.bf16 %v61_v6, %v60_v5  ;;  %671 = vmatprep.subr.bf16.mxu0 %v95_v3  ;;  %v71_v10 = vld [vmem:[#allocation7 + $0x8] sm:$0xff]  ;;  %v73_v12 = vld [vmem:[#allocation7 + $0x18] sm:$0xff]  ;;  %v62_v13 = vld [vmem:[#allocation2 + $0x10] sm:$0xff] }
  0x3a   :  { %672 = vmatpush3.bf16.msra.mxu0 %v95_v3  ;;  %v63_v14 = vld [vmem:[#allocation2 + $0x18] sm:$0xff]  ;;  %v86_v15 = vpack.c.bf16 %v71_v10, %v70_v9  ;;  %v87_v16 = vpack.c.bf16 %v73_v12, %v72_v11  ;;  %v74_v17 = vld [vmem:[#allocation7 + $0x20] sm:$0xff]  ;;  %v75_v18 = vld [vmem:[#allocation7 + $0x28] sm:$0xff] }
  0x3b   :  { %675 = vmatprep.mubr.msk.bf16.mxu0 %vm97_vm0, %v970_v8  ;;  %673 = vmatprep.subr.bf16.mxu0 %v96_v7  ;;  %v974_v19 = vpack.c.bf16 %v63_v14, %v62_v13  ;;  %v88_v20 = vpack.c.bf16 %v75_v18, %v74_v17  ;;  %v76_v21 = vld [vmem:[#allocation7 + $0x30] sm:$0xff]  ;;  %v77_v22 = vld [vmem:[#allocation7 + $0x38] sm:$0xff]  ;;  %v78_v24 = vld [vmem:[#allocation7 + $0x40] sm:$0xff] }
  0x3c   :  { %679 = vmatprep.subr.bf16.mxu1 %v86_v15  ;;  %v89_v23 = vpack.c.bf16 %v77_v22, %v76_v21  ;;  %v79_v25 = vld [vmem:[#allocation7 + $0x48] sm:$0xff]  ;;  %v80_v27 = vld [vmem:[#allocation7 + $0x50] sm:$0xff]  ;;  %v81_v28 = vld [vmem:[#allocation7 + $0x58] sm:$0xff] }
  0x3d   :  { %680 = vmatpush3.bf16.msra.mxu1 %v86_v15  ;;  %v90_v26 = vpack.c.bf16 %v79_v25, %v78_v24  ;;  %v91_v29 = vpack.c.bf16 %v81_v28, %v80_v27  ;;  %v82_v30 = vld [vmem:[#allocation7 + $0x60] sm:$0xff]  ;;  %v83_v31 = vld [vmem:[#allocation7 + $0x68] sm:$0xff]  ;;  %v84_v33 = vld [vmem:[#allocation7 + $0x70] sm:$0xff] }
  0x3e   :  { %674 = vmatpush3.bf16.msra.mxu0 %v96_v7  ;;  %681 = vmatprep.subr.bf16.mxu1 %v87_v16  ;;  %v92_v32 = vpack.c.bf16 %v83_v31, %v82_v30  ;;  %v85_v34 = vld [vmem:[#allocation7 + $0x78] sm:$0xff]  ;;  %v620_v42 = vld [vmem:[%s1055_s3] ss:$0 sm:$0xff]  ;;  %v240_v14 = vld [vmem:[#allocation7 + $0x88] sm:$0xff] }
  0x3f   :  { %v93_v35 = vpack.c.bf16 %v85_v34, %v84_v33  ;;  %v239_v13 = vld [vmem:[#allocation7 + $0x80] sm:$0xff]  ;;  %v241_v17 = vld [vmem:[#allocation7 + $0x90] sm:$0xff]  ;;  %v242_v18 = vld [vmem:[#allocation7 + $0x98] sm:$0xff] }
  0x40   :  { %v243_v21 = vld [vmem:[#allocation7 + $0xa0] sm:$0xff]  ;;  %v244_v22 = vld [vmem:[#allocation7 + $0xa8] sm:$0xff]  ;;  %v245_v24 = vld [vmem:[#allocation7 + $0xb0] sm:$0xff] }
  0x41   :  { %676 = vmatmul.mubr.msk.bf16.vlgmr.msra.gmra.mrb[0].mxu0 %vm97_vm0, %v974_v19  ;;  %682 = vmatpush3.bf16.msra.mxu1 %v87_v16  ;;  %v255_v16 = vpack.c.bf16 %v240_v14, %v239_v13  ;;  %v246_v25 = vld [vmem:[#allocation7 + $0xb8] sm:$0xff]  ;;  %v247_v27 = vld [vmem:[#allocation7 + $0xc0] sm:$0xff]  ;;  %v248_v28 = vld [vmem:[#allocation7 + $0xc8] sm:$0xff] }
  0x42   :  { %683 = vmatprep.subr.bf16.mxu1 %v88_v20  ;;  %703 = vmatprep.mubr.msk.bf16.mxu0 %vm97_vm0, %v970_v8  ;;  %v249_v30 = vld [vmem:[#allocation7 + $0xd0] sm:$0xff]  ;;  %v250_v31 = vld [vmem:[#allocation7 + $0xd8] sm:$0xff]  ;;  %v251_v33 = vld [vmem:[#allocation7 + $0xe0] sm:$0xff] }
  0x43   :  { %v252_v34 = vld [vmem:[#allocation7 + $0xe8] sm:$0xff]  ;;  %v414_v14 = vld [vmem:[#allocation7 + $0x140] sm:$0xff] }
  0x45   :  { %684 = vmatpush3.bf16.msra.mxu1 %v88_v20  ;;  %v256_v20 = vpack.c.bf16 %v242_v18, %v241_v17  ;;  %v416_v17 = vld [vmem:[#allocation7 + $0x150] sm:$0xff]  ;;  %v417_v18 = vld [vmem:[#allocation7 + $0x158] sm:$0xff] }
  0x46   :  { %685 = vmatprep.subr.bf16.mxu1 %v89_v23 }
  0x49   :  { %686 = vmatpush3.bf16.msra.mxu1 %v89_v23  ;;  %v257_v23 = vpack.c.bf16 %v244_v22, %v243_v21  ;;  %v418_v21 = vld [vmem:[#allocation7 + $0x160] sm:$0xff]  ;;  %v419_v22 = vld [vmem:[#allocation7 + $0x168] sm:$0xff] }
  0x4a   :  { %687 = vmatprep.subr.bf16.mxu1 %v90_v26 }
  0x4d   :  { %688 = vmatpush3.bf16.msra.mxu1 %v90_v26  ;;  %v258_v26 = vpack.c.bf16 %v246_v25, %v245_v24 }
  0x4e   :  { %689 = vmatprep.subr.bf16.mxu1 %v91_v29 }
  0x51   :  { %690 = vmatpush3.bf16.msra.mxu1 %v91_v29  ;;  %v259_v29 = vpack.c.bf16 %v248_v28, %v247_v27 }
  0x52   :  { %691 = vmatprep.subr.bf16.mxu1 %v92_v32 }
  0x55   :  { %692 = vmatpush3.bf16.msra.mxu1 %v92_v32  ;;  %v260_v32 = vpack.c.bf16 %v250_v31, %v249_v30 }
  0x56   :  { %693 = vmatprep.subr.bf16.mxu1 %v93_v35 }
  0x59   :  { %694 = vmatpush3.bf16.msra.mxu1 %v93_v35  ;;  %v261_v35 = vpack.c.bf16 %v252_v34, %v251_v33 }
 0x114   :  { %v677_v36 = vpop.f32.mrb[0].mxu0 }
 0x115   :  { %v138_v37 = vpop.f32.mrb[1].mxu0 }
 0x116   :  { %v678_v38 = vpop.f32.mrb[2].mxu0 }
 0x117   :  { %v154_v39 = vpack.c.bf16 %v678_v38, %v677_v36  ;;  %v141_v40 = vpop.f32.mrb[3].mxu0  ;;  %v253_v36 = vld [vmem:[#allocation7 + $0xf0] sm:$0xff] }
 0x118   :  { %v153_v41 = vpack.c.bf16 %v141_v40, %v138_v37  ;;  %v254_v37 = vld [vmem:[#allocation7 + $0xf8] sm:$0xff] }
 0x119   :  { %v262_v38 = vpack.c.bf16 %v254_v37, %v253_v36 }
 0x11a   :  { %695 = vmatprep.mubr.bf16.mxu1 %v153_v41 }
 0x11b   :  { %696 = vmatmul.mubr.bf16.vlgmr.msra.gmra.mrb[0].mxu1 %v154_v39 }
 0x1ee   :  { %v697_v43 = vpop.f32.mrb[0].mxu1 }
 0x1ef   :  { %v204_v44 = vadd.f32 %v697_v43, %v620_v42  ;;  %v195_v45 = vpop.f32.mrb[1].mxu1 }
 0x1f0   :  { %v196_v46 = vadd.f32 %v620_v42, %v195_v45  ;;  %v698_v47 = vpop.f32.mrb[2].mxu1  ;;  %v624_v45 = vld [vmem:[%s1055_s3 + $0x1] ss:$0 sm:$0xff] }
 0x1f1   :  { %v212_v48 = vmax.f32 %v204_v44, 0.0  ;;  %v207_v49 = vadd.f32 %v698_v47, %v620_v42  ;;  %v198_v50 = vpop.f32.mrb[3].mxu1 }
 0x1f2   :  { %v210_v51 = vmax.f32 %v196_v46, 0.0  ;;  %v199_v52 = vadd.f32 %v620_v42, %v198_v50 }
 0x1f3   :  { %v213_v53 = vmax.f32 %v207_v49, 0.0  ;;  %v216_v54 = vmul.f32 %v212_v48, %v212_v48 }
 0x1f4   :  { %v211_v55 = vmax.f32 %v199_v52, 0.0  ;;  %v214_v56 = vmul.f32 %v210_v51, %v210_v51 }
 0x1f5   :  { %222 = vadd.xlane.f32.xlu1 %v216_v54  ;;  %v217_v57 = vmul.f32 %v213_v53, %v213_v53 }
 0x1f6   :  { %218 = vadd.xlane.f32.xlu0 %v214_v56  ;;  %v215_v58 = vmul.f32 %v211_v55, %v211_v55 }
 0x1f9   :  { %224 = vadd.xlane.f32.xlu1 %v217_v57 }
 0x1fa   :  { %220 = vadd.xlane.f32.xlu0 %v215_v58 }
 0x282   :  { %v223_v59 = vpop.xlane.xlu1 %222 }
 0x283   :  { %v228_v60 = vmax.f32 %v223_v59, 1e-24  ;;  %v219_v61 = vpop.xlane.xlu0 %218 }
 0x284   :  { %v226_v62 = vmax.f32 %v219_v61, 1e-24  ;;  %v406_v61 = vld [vmem:[#allocation7 + $0x100] sm:$0xff] }
 0x285   :  { %761 = vrsqrt.f32 %v228_v60 }
 0x286   :  { %v225_v63 = vpop.xlane.xlu1 %224  ;;  %763 = vrsqrt.f32 %v226_v62  ;;  %v407_v62 = vld [vmem:[#allocation7 + $0x108] sm:$0xff] }
 0x287   :  { %v229_v0 = vmax.f32 %v225_v63, 1e-24  ;;  %v221_v1 = vpop.xlane.xlu0 %220  ;;  %v408_v63 = vld [vmem:[#allocation7 + $0x110] sm:$0xff] }
 0x288   :  { %v227_v2 = vmax.f32 %v221_v1, 1e-24  ;;  %v409_v1 = vld [vmem:[#allocation7 + $0x118] sm:$0xff] }
 0x289   :  { %765 = vrsqrt.f32 %v229_v0  ;;  %v422_v0 = vpack.c.bf16 %v407_v62, %v406_v61 }
 0x28a   :  { %767 = vrsqrt.f32 %v227_v2  ;;  %v423_v2 = vpack.c.bf16 %v409_v1, %v408_v63 }
 0x28b   :  { %735 = vmatprep.subr.bf16.mxu1 %v422_v0 }
 0x28c   :  { %736 = vmatpush3.bf16.msra.mxu1 %v422_v0 }
 0x28d   :  { %737 = vmatprep.subr.bf16.mxu1 %v423_v2 }
 0x28f   :  { %v762_v3 = vpop.eup %761 }
 0x290   :  { %v764_v4 = vpop.eup %763  ;;  %v991_v12 = vmul.f32 %v762_v3, %v212_v48  ;;  %v410_v3 = vld [vmem:[#allocation7 + $0x120] sm:$0xff]  ;;  %738 = vmatpush3.bf16.msra.mxu1 %v423_v2 }
 0x291   :  { %v983_v7 = vmul.f32 %v764_v4, %v210_v51  ;;  %v411_v4 = vld [vmem:[#allocation7 + $0x128] sm:$0xff] }
 0x293   :  { %v766_v5 = vpop.eup %765 }
 0x294   :  { %v768_v6 = vpop.eup %767  ;;  %v987_v10 = vmul.f32 %v766_v5, %v213_v53  ;;  %v424_v5 = vpack.c.bf16 %v411_v4, %v410_v3 }
 0x295   :  { %v985_v9 = vmul.f32 %v768_v6, %v211_v55  ;;  %v412_v6 = vld [vmem:[#allocation7 + $0x130] sm:$0xff] }
 0x296   :  { %v266_v15 = vpack.c.bf16 %v987_v10, %v991_v12  ;;  %739 = vmatprep.subr.bf16.mxu1 %v424_v5 }
 0x297   :  { %v265_v11 = vpack.c.bf16 %v985_v9, %v983_v7  ;;  %740 = vmatpush3.bf16.msra.mxu1 %v424_v5 }
 0x299   :  { %699 = vmatprep.subr.bf16.mxu0 %v265_v11 }
 0x29a   :  { %700 = vmatpush3.bf16.msra.mxu0 %v265_v11  ;;  %v413_v11 = vld [vmem:[#allocation7 + $0x138] sm:$0xff] }
 0x29b   :  { %701 = vmatprep.subr.bf16.mxu0 %v266_v15  ;;  %v425_v13 = vpack.c.bf16 %v413_v11, %v412_v6 }
 0x29d   :  { %741 = vmatprep.subr.bf16.mxu1 %v425_v13 }
 0x29e   :  { %702 = vmatpush3.bf16.msra.mxu0 %v266_v15  ;;  %v415_v15 = vld [vmem:[#allocation7 + $0x148] sm:$0xff]  ;;  %742 = vmatpush3.bf16.msra.mxu1 %v425_v13 }
 0x29f   :  { %707 = vmatprep.subr.bf16.mxu0 %v255_v16 }
 0x2a1   :  { %704 = vmatmul.mubr.msk.bf16.vlgmr.msra.gmra.mrb[4].mxu0 %vm97_vm0, %v974_v19 }
 0x2a2   :  { %708 = vmatpush3.bf16.msra.mxu0 %v255_v16  ;;  %v426_v16 = vpack.c.bf16 %v415_v15, %v414_v14 }
 0x2a3   :  { %709 = vmatprep.subr.bf16.mxu0 %v256_v20 }
 0x2a4   :  { %743 = vmatprep.subr.bf16.mxu1 %v426_v16 }
 0x2a5   :  { %744 = vmatpush3.bf16.msra.mxu1 %v426_v16 }
 0x2a6   :  { %710 = vmatpush3.bf16.msra.mxu0 %v256_v20  ;;  %v427_v20 = vpack.c.bf16 %v417_v18, %v416_v17 }
 0x2a7   :  { %711 = vmatprep.subr.bf16.mxu0 %v257_v23 }
 0x2a8   :  { %745 = vmatprep.subr.bf16.mxu1 %v427_v20 }
 0x2a9   :  { %746 = vmatpush3.bf16.msra.mxu1 %v427_v20 }
 0x2aa   :  { %712 = vmatpush3.bf16.msra.mxu0 %v257_v23  ;;  %v428_v23 = vpack.c.bf16 %v419_v22, %v418_v21 }
 0x2ab   :  { %713 = vmatprep.subr.bf16.mxu0 %v258_v26 }
 0x2ac   :  { %747 = vmatprep.subr.bf16.mxu1 %v428_v23 }
 0x2ad   :  { %748 = vmatpush3.bf16.msra.mxu1 %v428_v23 }
 0x2ae   :  { %714 = vmatpush3.bf16.msra.mxu0 %v258_v26 }
 0x2af   :  { %715 = vmatprep.subr.bf16.mxu0 %v259_v29 }
 0x2b2   :  { %716 = vmatpush3.bf16.msra.mxu0 %v259_v29 }
 0x2b3   :  { %717 = vmatprep.subr.bf16.mxu0 %v260_v32 }
 0x2b6   :  { %718 = vmatpush3.bf16.msra.mxu0 %v260_v32 }
 0x2b7   :  { %719 = vmatprep.subr.bf16.mxu0 %v261_v35 }
 0x2ba   :  { %720 = vmatpush3.bf16.msra.mxu0 %v261_v35 }
 0x2bb   :  { %721 = vmatprep.subr.bf16.mxu0 %v262_v38 }
 0x2be   :  { %722 = vmatpush3.bf16.msra.mxu0 %v262_v38 }
 0x374   :  { %v705_v39 = vpop.f32.mrb[4].mxu0 }
 0x375   :  { %v301_v40 = vpop.f32.mrb[5].mxu0 }
 0x376   :  { %v706_v41 = vpop.f32.mrb[6].mxu0 }
 0x377   :  { %v317_v42 = vpack.c.bf16 %v706_v41, %v705_v39  ;;  %v304_v43 = vpop.f32.mrb[7].mxu0 }
 0x378   :  { %v316_v44 = vpack.c.bf16 %v304_v43, %v301_v40 }
 0x37a   :  { %723 = vmatprep.mubr.bf16.mxu0 %v316_v44 }
 0x37b   :  { %724 = vmatmul.mubr.bf16.vlgmr.msra.gmra.mrb[8].mxu0 %v317_v42 }
 0x37c   :  { %731 = vmatprep.mubr.msk.bf16.mxu0 %vm97_vm0, %v970_v8 }
 0x44e   :  { %v725_v46 = vpop.f32.mrb[8].mxu0 }
 0x44f   :  { %v358_v47 = vpop.f32.mrb[9].mxu0  ;;  %v367_v48 = vadd.f32 %v725_v46, %v624_v45 }
 0x450   :  { %v359_v49 = vadd.f32 %v624_v45, %v358_v47  ;;  %v726_v50 = vpop.f32.mrb[10].mxu0 }
 0x451   :  { %v361_v51 = vpop.f32.mrb[11].mxu0  ;;  %v370_v53 = vadd.f32 %v726_v50, %v624_v45  ;;  %v1002_v55 = vmax.f32 %v367_v48, 0.0 }
 0x452   :  { %v373_v52 = vmax.f32 %v359_v49, 0.0  ;;  %v362_v54 = vadd.f32 %v624_v45, %v361_v51  ;;  %v421_v45 = vld [vmem:[#allocation7 + $0x178] sm:$0xff]  ;;  %v628_v51 = vld [vmem:[%s1055_s3 + $0x2] ss:$0 sm:$0xff]  ;;  %s892_s3 = smov [#allocation8]  }
 0x453   :  { %v1004_v58 = vmax.f32 %v370_v53, 0.0  ;;  %v379_v59 = vmul.f32 %v1002_v55, %v1002_v55  ;;  %s605_s6 = sshll.u32 %s892_s3, 4  ;;  %s606_s6 = int_to_ptr.vmem [resolvable:$true] %s605_s6 }
 0x454   :  { %v374_v56 = vmax.f32 %v362_v54, 0.0  ;;  %v377_v57 = vmul.f32 %v373_v52, %v373_v52  ;;  %s859_s7 = scalar_lea.vmem %s606_s6, 512  ;;  %p864_p11 = scmp.lt.s32.totalorder %s606_s6, %s606_s6 }
 0x455   :  { %v380_v60 = vmul.f32 %v1004_v58, %v1004_v58  ;;  %p860_p10 = scmp.ne.s32.totalorder %s606_s6, %s859_s7  ;;  %p865_p12 = scmp.lt.s32.totalorder %s859_s7, %s859_s7 }
 0x456   :  { %381 = vadd.xlane.f32.xlu0 %v377_v57  ;;  %v378_v8 = vmul.f32 %v374_v56, %v374_v56 }
 0x457   :  { %p866_p13 = por %p865_p12, %p864_p11 }
 0x458   :  { %383 = vadd.xlane.f32.xlu1 %v378_v8 }
 0x459   :  { %p867_p0 = pnand %p866_p13, %p860_p10 }
 0x45a   :  { %385 = vadd.xlane.f32.xlu0 %v379_v59 }
 0x45c   :  { %387 = vadd.xlane.f32.xlu1 %v380_v60 }
 0x4e3   :  { %v382_v24 = vpop.xlane.xlu0 %381 }
 0x4e4   :  { %v389_v25 = vmax.f32 %v382_v24, 1e-24 }
 0x4e5   :  { %v384_v26 = vpop.xlane.xlu1 %383 }
 0x4e6   :  { %769 = vrsqrt.f32 %v389_v25  ;;  %v390_v27 = vmax.f32 %v384_v26, 1e-24 }
 0x4e7   :  { %v386_v28 = vpop.xlane.xlu0 %385 }
 0x4e8   :  { %771 = vrsqrt.f32 %v390_v27  ;;  %v391_v29 = vmax.f32 %v386_v28, 1e-24 }
 0x4e9   :  { %v388_v30 = vpop.xlane.xlu1 %387 }
 0x4ea   :  { %773 = vrsqrt.f32 %v391_v29  ;;  %v392_v31 = vmax.f32 %v388_v30, 1e-24 }
 0x4ec   :  { %775 = vrsqrt.f32 %v392_v31 }
 0x4f0   :  { %v770_v32 = vpop.eup %769 }
 0x4f1   :  { %v397_v33 = vmul.f32 %v770_v32, %v373_v52 }
 0x4f2   :  { %v772_v34 = vpop.eup %771 }
 0x4f3   :  { %v398_v35 = vmul.f32 %v772_v34, %v374_v56  ;;  %v1011_v37 = vadd.f32 %v397_v33, %v983_v7 }
 0x4f4   :  { %v774_v36 = vpop.eup %773 }
 0x4f5   :  { %v1014_v38 = vadd.f32 %v398_v35, %v985_v9  ;;  %v399_v39 = vmul.f32 %v774_v36, %v1002_v55  ;;  %v420_v9 = vld [vmem:[#allocation7 + $0x170] sm:$0xff] }
 0x4f6   :  { %v776_v40 = vpop.eup %775  ;;  %v429_v46 = vpack.c.bf16 %v421_v45, %v420_v9 }
 0x4f7   :  { %v432_v41 = vpack.c.bf16 %v1014_v38, %v1011_v37  ;;  %v400_v42 = vmul.f32 %v776_v40, %v1004_v58  ;;  %v1021_v43 = vadd.f32 %v399_v39, %v991_v12 }
 0x4f8   :  { %749 = vmatprep.subr.bf16.mxu1 %v429_v46 }
 0x4f9   :  { %727 = vmatprep.subr.bf16.mxu0 %v432_v41  ;;  %v1024_v44 = vadd.f32 %v400_v42, %v987_v10  ;;  %750 = vmatpush3.bf16.msra.mxu1 %v429_v46 }
 0x4fa   :  { %728 = vmatpush3.bf16.msra.mxu0 %v432_v41 }
 0x4fb   :  { %v433_v7 = vpack.c.bf16 %v1024_v44, %v1021_v43 }
 0x4fd   :  { %729 = vmatprep.subr.bf16.mxu0 %v433_v7 }
 0x4fe   :  { %730 = vmatpush3.bf16.msra.mxu0 %v433_v7 }
 0x501   :  { %732 = vmatmul.mubr.msk.bf16.vlgmr.msra.gmra.mrb[12].mxu0 %vm97_vm0, %v974_v19 }
 0x5d4   :  { %v733_v47 = vpop.f32.mrb[12].mxu0 }
 0x5d5   :  { %v468_v12 = vpop.f32.mrb[13].mxu0 }
 0x5d6   :  { %v734_v48 = vpop.f32.mrb[14].mxu0 }
 0x5d7   :  { %v484_v49 = vpack.c.bf16 %v734_v48, %v733_v47  ;;  %v471_v10 = vpop.f32.mrb[15].mxu0 }
 0x5d8   :  { %v483_v50 = vpack.c.bf16 %v471_v10, %v468_v12 }
 0x5da   :  { %751 = vmatprep.mubr.bf16.mxu1 %v483_v50 }
 0x5db   :  { %752 = vmatmul.mubr.bf16.vlgmr.msra.gmra.mrb[4].mxu1 %v484_v49 }
 0x6ae   :  { %v753_v52 = vpop.f32.mrb[4].mxu1 }
 0x6af   :  { %v525_v53 = vpop.f32.mrb[5].mxu1  ;;  %v534_v19 = vadd.f32 %v753_v52, %v628_v51 }
 0x6b0   :  { %v526_v54 = vadd.f32 %v628_v51, %v525_v53  ;;  %v754_v55 = vpop.f32.mrb[6].mxu1 }
 0x6b1   :  { %v528_v56 = vpop.f32.mrb[7].mxu1  ;;  %v537_v58 = vadd.f32 %v754_v55, %v628_v51  ;;  %v542_v59 = vmax.f32 %v534_v19, 0.0 }
 0x6b2   :  { %v540_v57 = vmax.f32 %v526_v54, 0.0  ;;  %v529_v8 = vadd.f32 %v628_v51, %v528_v56 }
 0x6b3   :  { %v543_v62 = vmax.f32 %v537_v58, 0.0  ;;  %v546_v0 = vmul.f32 %v542_v59, %v542_v59 }
 0x6b4   :  { %v541_v60 = vmax.f32 %v529_v8, 0.0  ;;  %v544_v61 = vmul.f32 %v540_v57, %v540_v57 }
 0x6b5   :  { %v547_v1 = vmul.f32 %v543_v62, %v543_v62 }
 0x6b6   :  { %548 = vadd.xlane.f32.xlu0 %v544_v61  ;;  %v545_v63 = vmul.f32 %v541_v60, %v541_v60 }
 0x6b8   :  { %550 = vadd.xlane.f32.xlu1 %v545_v63 }
 0x6ba   :  { %552 = vadd.xlane.f32.xlu0 %v546_v0 }
 0x6bc   :  { %554 = vadd.xlane.f32.xlu1 %v547_v1 }
 0x743   :  { %v549_v2 = vpop.xlane.xlu0 %548 }
 0x744   :  { %v556_v3 = vmax.f32 %v549_v2, 1e-24 }
 0x745   :  { %v551_v4 = vpop.xlane.xlu1 %550 }
 0x746   :  { %777 = vrsqrt.f32 %v556_v3  ;;  %v557_v5 = vmax.f32 %v551_v4, 1e-24 }
 0x747   :  { %v553_v6 = vpop.xlane.xlu0 %552 }
 0x748   :  { %779 = vrsqrt.f32 %v557_v5  ;;  %v558_v11 = vmax.f32 %v553_v6, 1e-24 }
 0x749   :  { %v555_v13 = vpop.xlane.xlu1 %554 }
 0x74a   :  { %781 = vrsqrt.f32 %v558_v11  ;;  %v559_v14 = vmax.f32 %v555_v13, 1e-24 }
 0x74c   :  { %783 = vrsqrt.f32 %v559_v14 }
 0x750   :  { %v778_v15 = vpop.eup %777 }
 0x751   :  { %v564_v16 = vmul.f32 %v778_v15, %v540_v57 }
 0x752   :  { %v780_v17 = vpop.eup %779 }
 0x753   :  { %v568_v18 = vadd.f32 %v564_v16, %v1011_v37  ;;  %v565_v20 = vmul.f32 %v780_v17, %v541_v60 }
 0x754   :  { %v782_v21 = vpop.eup %781 }
 0x755   :  { %v572_v22 = vmul.f32 %v568_v18, %v568_v18  ;;  %v569_v23 = vadd.f32 %v565_v20, %v1014_v38  ;;  %v566_v24 = vmul.f32 %v782_v21, %v542_v59 }
 0x756   :  { %v784_v25 = vpop.eup %783 }
 0x757   :  { %576 = vadd.xlane.f32.xlu0 %v572_v22  ;;  %v573_v26 = vmul.f32 %v569_v23, %v569_v23  ;;  %v570_v27 = vadd.f32 %v566_v24, %v1021_v43  ;;  %v567_v28 = vmul.f32 %v784_v25, %v543_v62 }
 0x759   :  { %578 = vadd.xlane.f32.xlu1 %v573_v26  ;;  %v574_v29 = vmul.f32 %v570_v27, %v570_v27  ;;  %v571_v30 = vadd.f32 %v567_v28, %v1024_v44 }
 0x75b   :  { %580 = vadd.xlane.f32.xlu0 %v574_v29  ;;  %v575_v31 = vmul.f32 %v571_v30, %v571_v30 }
 0x75d   :  { %582 = vadd.xlane.f32.xlu1 %v575_v31 }
 0x7e4   :  { %v577_v32 = vpop.xlane.xlu0 %576 }
 0x7e5   :  { %v584_v33 = vmax.f32 %v577_v32, 1e-24 }
 0x7e6   :  { %v579_v34 = vpop.xlane.xlu1 %578 }
 0x7e7   :  { %785 = vrsqrt.f32 %v584_v33  ;;  %v585_v35 = vmax.f32 %v579_v34, 1e-24 }
 0x7e8   :  { %v581_v36 = vpop.xlane.xlu0 %580 }
 0x7e9   :  { %787 = vrsqrt.f32 %v585_v35  ;;  %v586_v37 = vmax.f32 %v581_v36, 1e-24 }
 0x7ea   :  { %v583_v38 = vpop.xlane.xlu1 %582 }
 0x7eb   :  { %789 = vrsqrt.f32 %v586_v37  ;;  %v587_v39 = vmax.f32 %v583_v38, 1e-24 }
 0x7ed   :  { %791 = vrsqrt.f32 %v587_v39 }
 0x7f1   :  { %v786_v40 = vpop.eup %785 }
 0x7f2   :  { %v592_v41 = vmul.f32 %v786_v40, %v568_v18 }
 0x7f3   :  { %v788_v42 = vpop.eup %787 }
 0x7f4   :  { %v593_v43 = vmul.f32 %v788_v42, %v569_v23  ;;  %596 = vst [vmem:[#allocation8] sm:$0xff] %v592_v41 }
 0x7f5   :  { %v790_v44 = vpop.eup %789 }
 0x7f6   :  { %v594_v7 = vmul.f32 %v790_v44, %v570_v27  ;;  %597 = vst [vmem:[#allocation8 + $0x8] sm:$0xff] %v593_v43 }
 0x7f7   :  { %v792_v9 = vpop.eup %791 }
 0x7f8   :  { %v595_v45 = vmul.f32 %v792_v9, %v571_v30  ;;  %598 = vst [vmem:[#allocation8 + $0x10] sm:$0xff] %v594_v7 }
 0x7fa   :  { %599 = vst [vmem:[#allocation8 + $0x18] sm:$0xff] %v595_v45 }
 0x7fb   :  { %870 = shalt.err (!%p867_p0)
}
 0x7fc   :  { %s871_s10 = scalar_lea.hbm %s1056_s4, 512 }
 0x7fd   :  { %p872_p1 = scmp.ne.s32.totalorder %s1056_s4, %s871_s10  ;;  %p875_p2 = scmp.lt.u32.totalorder %s871_s10, %s1056_s4 }
 0x7ff   :  { %p877_p3 = pnand %p875_p2, %p872_p1 }
 0x801   :  { %880 = shalt.err (!%p877_p3)
}
 0x802   :  { %611 = dma.vmem_to_hbm [thread:$0]  %s606_s6, 512, %s1056_s4, [#allocation4], %s889_s27, %s889_s27, %s890_s28  }
 0x803   :  { %885 = dma.done.wait [#allocation4], 512  }
 0x804   :  { %886 = vsyncadd [#allocation4], 4294966784 }
 0x805   :  { %615 = vsyncpa [#allocation3], 1 }
 0x806   :  { %616 = vsyncpa [#allocation6], 1 }
 0x807   :  { %617 = vsyncpa [#allocation4], 1 }

</bundles_post_ra>
